<compile_context>
chip_gen: v7x
topology: tpu7x:2x2x1
jax: 0.10.0
libtpu: 0.0.40
codegen_flags: <defaults>
</compile_context>

<pallas_src>
import functools

import jax
import jax.numpy as jnp
from jax.experimental import pallas as pl
from jax.experimental.pallas import tpu as pltpu


def _round_up(x: int, m: int) -> int:
    return ((x + m - 1) // m) * m


def _mlp_kernel(x_ref, w1_ref, b1_ref, w2_ref, b2_ref, out_ref):
    """out = relu(x @ w1 + b1) @ w2 + b2 on one batch tile.

    x arrives as fp32 (no wrapper-side bf16 copy of the dominant HBM stream);
    it is cast to bf16 here so both matmuls run bf16 x bf16 -> fp32 on the
    MXU.  Bias-add / ReLU stay in fp32 on the accumulator; layer-1
    activations are deliberately downcast to bf16 before the second matmul.
    """
    x = x_ref[...].astype(jnp.bfloat16)                           # (TILE_B, K)
    h = jnp.dot(x, w1_ref[...], preferred_element_type=jnp.float32)
    h = jnp.maximum(h + b1_ref[...], 0.0)
    o = jnp.dot(h.astype(jnp.bfloat16), w2_ref[...],
                preferred_element_type=jnp.float32)
    out_ref[...] = o + b2_ref[...]                                # lane-dense fp32 store


@functools.partial(jax.jit, static_argnames=("tile_b",))
def representation_mlp_net(x, w1, b1, w2, b2, *, tile_b=None):
    """Runs the fused MLP kernel.

    Args:
      x:  (B, ...) raw state; flattened to (B, input_size).
      w1: (input_size, num_planes)
      b1: (num_planes,)
      w2: (num_planes, hidden_dim)
      b2: (hidden_dim,)
    Returns:
      hidden_state: (B, hidden_dim) float32
    """
    LANE, SUB = 128, 8
    TARGET_TILE_B = 1024   # fp32 x tile = 4 MiB/buffer @ K=1024: fits v5e 16 MiB scoped default
    MIN_SPLIT_B = 256      # below this, splitting across 2 TCs is pure overhead

    batch = x.shape[0]
    x2d = x.reshape(batch, -1)                 # free view; stays fp32 (no extra HBM copy)
    input_size = x2d.shape[1]
    num_planes = w1.shape[1]
    hidden_dim = w2.shape[1]

    # Lane-pad only the tiny weight/bias feature dims; K is left unpadded
    # (block dim equals the full array dim, so no (8,128) constraint issue).
    p_pad = _round_up(num_planes, LANE)
    h_pad = _round_up(hidden_dim, LANE)

    # --- batch tiling ---------------------------------------------------------
    # Aim for ~TARGET_TILE_B rows per tile; once batch is big enough use an
    # even number (>= 2) of tiles so both v7x TensorCores get work, and derive
    # tile_b from cdiv(batch, num_tiles) so the last tile is never mostly
    # padding.  The grid uses cdiv, so no batch padding is materialized:
    # Pallas masks the partial last block's writeback.
    if tile_b is None:
        num_tiles = pl.cdiv(batch, TARGET_TILE_B)
        if batch >= 2 * MIN_SPLIT_B:
            num_tiles = max(num_tiles, 2)
        if num_tiles > 1:
            num_tiles = _round_up(num_tiles, 2)
        tile_b = _round_up(pl.cdiv(batch, num_tiles), SUB)
    tile_b = max(SUB, _round_up(tile_b, SUB))
    num_tiles = pl.cdiv(batch, tile_b)

    # --- weight/bias prep (tiny; zero padding keeps results exact) ------------
    w1p = jnp.pad(w1.astype(jnp.bfloat16), ((0, 0), (0, p_pad - num_planes)))
    b1p = jnp.pad(b1.astype(jnp.float32),
                  ((0, p_pad - num_planes),)).reshape(1, p_pad)
    w2p = jnp.pad(w2.astype(jnp.bfloat16),
                  ((0, p_pad - num_planes), (0, h_pad - hidden_dim)))
    b2p = jnp.pad(b2.astype(jnp.float32),
                  ((0, h_pad - hidden_dim),)).reshape(1, h_pad)

    flops = 2 * batch * (input_size * num_planes + num_planes * hidden_dim)
    bytes_accessed = (x2d.size * 4 + w1p.size * 2 + w2p.size * 2
                      + b1p.size * 4 + b2p.size * 4 + batch * h_pad * 4)

    # Working set: double-buffered fp32 x tile (2x4 MiB) + out tile (2x0.5 MiB)
    # + resident weights (~0.6 MiB) + fp32/bf16 intermediates (~1.5 MiB)
    # ~= 11 MiB at tile_b=1024.  32 MiB gives headroom on every generation and
    # stays well under v7x's 64 MiB physical VMEM.
    vmem_limit = 32 << 20

    out = pl.pallas_call(
        _mlp_kernel,
        out_shape=jax.ShapeDtypeStruct((batch, h_pad), jnp.float32),
        grid=(num_tiles,),
        in_specs=[
            # streaming operand: fp32 x, tiled on batch (auto double-buffered)
            pl.BlockSpec((tile_b, input_size), lambda i: (i, 0)),
            # weights / biases: constant block index -> VMEM-resident.
            # TODO(synk): mark these pipeline_mode=pl.Buffered(1) once single-
            # buffering of constant-index operands is verified on this JAX rev
            # (would save ~0.3 MiB VMEM; no measurable perf impact expected).
            pl.BlockSpec((input_size, p_pad), lambda i: (0, 0)),
            pl.BlockSpec((1, p_pad), lambda i: (0, 0)),
            pl.BlockSpec((p_pad, h_pad), lambda i: (0, 0)),
            pl.BlockSpec((1, h_pad), lambda i: (0, 0)),
        ],
        out_specs=pl.BlockSpec((tile_b, h_pad), lambda i: (i, 0)),
        compiler_params=pltpu.CompilerParams(
            dimension_semantics=("parallel",),   # shards batch tiles across TCs on v7x
            vmem_limit_bytes=vmem_limit,
        ),
        cost_estimate=pl.CostEstimate(
            flops=flops, transcendentals=0, bytes_accessed=bytes_accessed),
    )(x2d, w1p, b1p, w2p, b2p)

    # Drop only the lane padding on the hidden dim (tiny; fuses with downstream
    # consumers under jit).  No batch padding to strip.
    return out[:, :hidden_dim]


def init_params(key, input_size, num_planes, hidden_dim):
    """Deterministic init mimicking torch.nn.Linear default U(-1/sqrt(fan_in), 1/sqrt(fan_in))."""
    k1, k2, k3, k4 = jax.random.split(key, 4)
    bound1 = 1.0 / (input_size ** 0.5)
    bound2 = 1.0 / (num_planes ** 0.5)
    w1 = jax.random.uniform(k1, (input_size, num_planes), jnp.float32, -bound1, bound1)
    b1 = jax.random.uniform(k2, (num_planes,), jnp.float32, -bound1, bound1)
    w2 = jax.random.uniform(k3, (num_planes, hidden_dim), jnp.float32, -bound2, bound2)
    b2 = jax.random.uniform(k4, (hidden_dim,), jnp.float32, -bound2, bound2)
    return w1, b1, w2, b2


if __name__ == "__main__":
    # Small shapes consistent with the module: raw state (B, C, H, W) = (2, 4, 16, 16)
    # => input_size = 4*16*16 = 1024, num_planes = 64, hidden_dim = 32.
    B, C, H, W = 2, 4, 16, 16
    input_size = C * H * W
    num_planes = 64
    hidden_dim = 32

    key = jax.random.PRNGKey(0)
    kx, kp = jax.random.split(key)
    x = jax.random.normal(kx, (B, C, H, W), dtype=jnp.float32)
    w1, b1, w2, b2 = init_params(kp, input_size, num_planes, hidden_dim)

    out = representation_mlp_net(x, w1, b1, w2, b2)
    out = jax.block_until_ready(out)
    assert out.shape == (B, hidden_dim)

    # Pure-JAX reference with the same bf16-operand / fp32-accumulate precision.
    x2d = x.reshape(B, -1)
    xb = x2d.astype(jnp.bfloat16).astype(jnp.float32)
    w1b = w1.astype(jnp.bfloat16).astype(jnp.float32)
    w2b = w2.astype(jnp.bfloat16).astype(jnp.float32)
    h_ref = jnp.maximum(xb @ w1b + b1, 0.0)
    ref = h_ref.astype(jnp.bfloat16).astype(jnp.float32) @ w2b + b2
    assert jnp.allclose(out, ref, atol=3e-3, rtol=3e-3), (
        float(jnp.max(jnp.abs(out - ref))))

    # Also sanity-check against the full fp32 torch-equivalent forward (loose tol
    # since the kernel deliberately uses bf16 matmul operands).
    ref_f32 = jnp.maximum(x2d @ w1 + b1, 0.0) @ w2 + b2
    assert jnp.allclose(out, ref_f32, atol=5e-2, rtol=5e-2)

    print("KERNEL_OK")
</pallas_src>

<mosaic_0001>
module attributes {stable_mosaic.version = 11 : i64} {
  func.func @_mlp_kernel(%arg0: i32, %arg1: memref<8x1024xf32, #tpu.memory_space<vmem>>, %arg2: memref<1024x128xbf16, #tpu.memory_space<vmem>>, %arg3: memref<1x128xf32, #tpu.memory_space<vmem>>, %arg4: memref<128x128xbf16, #tpu.memory_space<vmem>>, %arg5: memref<1x128xf32, #tpu.memory_space<vmem>>, %arg6: memref<8x128xf32, #tpu.memory_space<vmem>>) attributes {dimension_semantics = [#tpu.dimension_semantics<parallel>], iteration_bounds = array<i64: 1>, scalar_prefetch = 0 : i64, scratch_operands = 0 : i64, tpu.core_type = #tpu.core_type<tc>, window_params = [{transform_indices = @transform_0, window_bounds = array<i64: 8, 1024>}, {pipeline_mode = #tpu.pipeline_mode<synchronous>, transform_indices = @transform_1, window_bounds = array<i64: 1024, 128>}, {pipeline_mode = #tpu.pipeline_mode<synchronous>, transform_indices = @transform_2, window_bounds = array<i64: 1, 128>}, {pipeline_mode = #tpu.pipeline_mode<synchronous>, transform_indices = @transform_3, window_bounds = array<i64: 128, 128>}, {pipeline_mode = #tpu.pipeline_mode<synchronous>, transform_indices = @transform_4, window_bounds = array<i64: 1, 128>}, {transform_indices = @transform_5, window_bounds = array<i64: 8, 128>}]} {
    %c0 = arith.constant 0 : index
    %c0_0 = arith.constant 0 : index
    %0 = vector.load %arg1[%c0, %c0_0] : memref<8x1024xf32, #tpu.memory_space<vmem>>, vector<8x1024xf32>
    %1 = arith.truncf %0 : vector<8x1024xf32> to vector<8x1024xbf16>
    %c0_1 = arith.constant 0 : index
    %c0_2 = arith.constant 0 : index
    %2 = vector.load %arg2[%c0_1, %c0_2] : memref<1024x128xbf16, #tpu.memory_space<vmem>>, vector<1024x128xbf16>
    %cst = arith.constant dense<0.000000e+00> : vector<8x128xf32>
    %3 = tpu.matmul %1, %2, %cst {dimension_numbers = #tpu.dot_dimension_numbers<[1], [0], [0], [1], [0, 0, 1, 1], [], []>} : vector<8x1024xbf16>, vector<1024x128xbf16>, vector<8x128xf32> -> vector<8x128xf32>
    %c0_3 = arith.constant 0 : index
    %c0_4 = arith.constant 0 : index
    %4 = vector.load %arg3[%c0_3, %c0_4] : memref<1x128xf32, #tpu.memory_space<vmem>>, vector<1x128xf32>
    %5 = vector.broadcast %4 : vector<1x128xf32> to vector<8x128xf32>
    %6 = arith.addf %3, %5 : vector<8x128xf32>
    %cst_5 = arith.constant 0.000000e+00 : f32
    %7 = vector.broadcast %cst_5 : f32 to vector<8x128xf32>
    %8 = arith.maximumf %6, %7 : vector<8x128xf32>
    %9 = arith.truncf %8 : vector<8x128xf32> to vector<8x128xbf16>
    %c0_6 = arith.constant 0 : index
    %c0_7 = arith.constant 0 : index
    %10 = vector.load %arg4[%c0_6, %c0_7] : memref<128x128xbf16, #tpu.memory_space<vmem>>, vector<128x128xbf16>
    %cst_8 = arith.constant dense<0.000000e+00> : vector<8x128xf32>
    %11 = tpu.matmul %9, %10, %cst_8 {dimension_numbers = #tpu.dot_dimension_numbers<[1], [0], [0], [1], [0, 0, 1, 1], [], []>} : vector<8x128xbf16>, vector<128x128xbf16>, vector<8x128xf32> -> vector<8x128xf32>
    %c0_9 = arith.constant 0 : index
    %c0_10 = arith.constant 0 : index
    %12 = vector.load %arg5[%c0_9, %c0_10] : memref<1x128xf32, #tpu.memory_space<vmem>>, vector<1x128xf32>
    %13 = vector.broadcast %12 : vector<1x128xf32> to vector<8x128xf32>
    %14 = arith.addf %11, %13 : vector<8x128xf32>
    %c0_11 = arith.constant 0 : index
    %c0_12 = arith.constant 0 : index
    %15 = vector.load %arg6[%c0_11, %c0_12] : memref<8x128xf32, #tpu.memory_space<vmem>>, vector<8x128xf32>
    tpu.vector_store %arg6[%c0_11, %c0_12], %14 {strides = array<i32>} : memref<8x128xf32, #tpu.memory_space<vmem>>, vector<8x128xf32>,
    return
  }
  func.func @transform_0(%arg0: i32) -> (i32, i32) {
    %c0_i32 = arith.constant 0 : i32
    %c0_i32_0 = arith.constant 0 : i32
    return %arg0, %c0_i32 : i32, i32
  }
  func.func @transform_1(%arg0: i32) -> (i32, i32) {
    %c0_i32 = arith.constant 0 : i32
    %c0_i32_0 = arith.constant 0 : i32
    %c0_i32_1 = arith.constant 0 : i32
    return %c0_i32, %c0_i32_0 : i32, i32
  }
  func.func @transform_2(%arg0: i32) -> (i32, i32) {
    %c0_i32 = arith.constant 0 : i32
    %c0_i32_0 = arith.constant 0 : i32
    %c0_i32_1 = arith.constant 0 : i32
    return %c0_i32, %c0_i32_0 : i32, i32
  }
  func.func @transform_3(%arg0: i32) -> (i32, i32) {
    %c0_i32 = arith.constant 0 : i32
    %c0_i32_0 = arith.constant 0 : i32
    %c0_i32_1 = arith.constant 0 : i32
    return %c0_i32, %c0_i32_0 : i32, i32
  }
  func.func @transform_4(%arg0: i32) -> (i32, i32) {
    %c0_i32 = arith.constant 0 : i32
    %c0_i32_0 = arith.constant 0 : i32
    %c0_i32_1 = arith.constant 0 : i32
    return %c0_i32, %c0_i32_0 : i32, i32
  }
  func.func @transform_5(%arg0: i32) -> (i32, i32) {
    %c0_i32 = arith.constant 0 : i32
    %c0_i32_0 = arith.constant 0 : i32
    return %arg0, %c0_i32 : i32, i32
  }
}

</mosaic_0001>

<bundles_post_ra>
// kernel: representation_mlp_net.1
= control target key start
LH: loop header
LB: loop body
LE: loop exit
PB: predicated region body
PF: predicated region fallthrough
CT: control target
= control target key end

     0   :  { %10 = vsyncpa [#allocation3], 0  ;;  %v45_v29 = vlaneseq  ;;  %v1240_v34 = vmov 1983009808   ;;  %vm1242_vm0 = vmmov 0   ;;  %s1544_s0 = inlined_call_operand.vmem [shape: f32[2,1024], index: 0, kind: input, shape index: {}]   ;;  %s1545_s1 = inlined_call_operand.vmem [shape: bf16[1024,128], index: 1, kind: input, shape index: {}]   ;;  %s1546_s2 = inlined_call_operand.vmem [shape: f32[1,128], index: 2, kind: input, shape index: {}]   ;;  %s1547_s3 = inlined_call_operand.vmem [shape: bf16[128,128], index: 3, kind: input, shape index: {}]   ;;  %s1548_s4 = inlined_call_operand.vmem [shape: f32[1,128], index: 4, kind: input, shape index: {}]   ;;  %s1549_s5 = inlined_call_operand.hbm [shape: f32[2,128], index: 5, kind: output, shape index: {}]  }
   0x1   :  { %v1132_v0 = vld [vmem:[%s1545_s1 + $0x40] sm:$0xff]   ;;  %v1136_v4 = vld [vmem:[%s1545_s1 + $0x48] sm:$0xff]   ;;  %v1140_v8 = vld [vmem:[%s1545_s1 + $0x50] sm:$0xff]   ;;  %v43_v35 = vunpack.c.l.s4 %v1240_v34 }
   0x2   :  { %v1133_v1 = vld [vmem:[%s1545_s1 + $0xc0] sm:$0xff]   ;;  %1009 = vmatprep.subr.bf16.mxu0 %v1132_v0  ;;  %v1137_v5 = vld [vmem:[%s1545_s1 + $0xc8] sm:$0xff]   ;;  %v1141_v9 = vld [vmem:[%s1545_s1 + $0xd0] sm:$0xff]   ;;  %v46_v36 = vshrl.u32 %v45_v29, 7 }
   0x3   :  { %v1134_v2 = vld [vmem:[%s1545_s1] sm:$0xff]   ;;  %1031 = vmatprep.subr.bf16.mxu1 %v1133_v1  ;;  %v1138_v6 = vld [vmem:[%s1545_s1 + $0x8] sm:$0xff]   ;;  %v1142_v10 = vld [vmem:[%s1545_s1 + $0x10] sm:$0xff]   ;;  %v44_v40 = vunpack.c.0.s8 %v43_v35 }
   0x4   :  { %v1135_v3 = vld [vmem:[%s1545_s1 + $0x80] sm:$0xff]   ;;  %1010 = vmatpush3.bf16.msra.mxu0 %v1134_v2  ;;  %v1139_v7 = vld [vmem:[%s1545_s1 + $0x88] sm:$0xff]   ;;  %v1143_v11 = vld [vmem:[%s1545_s1 + $0x90] sm:$0xff]  }
   0x5   :  { %1032 = vmatpush3.bf16.msra.mxu1 %v1135_v3  ;;  %1011 = vmatprep.subr.bf16.mxu0 %v1136_v4  ;;  %v1144_v12 = vld [vmem:[%s1545_s1 + $0x58] sm:$0xff]   ;;  %v1148_v16 = vld [vmem:[%s1545_s1 + $0x60] sm:$0xff]   ;;  %v1152_v20 = vld [vmem:[%s1545_s1 + $0x68] sm:$0xff]   ;;  %v1390_v43 = vsub.s32 %v44_v40, %v46_v36 }
   0x6   :  { %1033 = vmatprep.subr.bf16.mxu1 %v1137_v5  ;;  %v1145_v13 = vld [vmem:[%s1545_s1 + $0xd8] sm:$0xff]   ;;  %v1149_v17 = vld [vmem:[%s1545_s1 + $0xe0] sm:$0xff]   ;;  %v1153_v21 = vld [vmem:[%s1545_s1 + $0xe8] sm:$0xff]  }
   0x7   :  { %v1146_v14 = vld [vmem:[%s1545_s1 + $0x18] sm:$0xff]   ;;  %v1150_v18 = vld [vmem:[%s1545_s1 + $0x20] sm:$0xff]   ;;  %v1154_v22 = vld [vmem:[%s1545_s1 + $0x28] sm:$0xff]  }
   0x8   :  { %1012 = vmatpush3.bf16.msra.mxu0 %v1138_v6  ;;  %v1147_v15 = vld [vmem:[%s1545_s1 + $0x98] sm:$0xff]   ;;  %v1151_v19 = vld [vmem:[%s1545_s1 + $0xa0] sm:$0xff]   ;;  %v1155_v23 = vld [vmem:[%s1545_s1 + $0xa8] sm:$0xff]  }
   0x9   :  { %1034 = vmatpush3.bf16.msra.mxu1 %v1139_v7  ;;  %1013 = vmatprep.subr.bf16.mxu0 %v1140_v8  ;;  %v1156_v24 = vld [vmem:[%s1545_s1 + $0x70] sm:$0xff]   ;;  %v1160_v28 = vld [vmem:[%s1545_s1 + $0x78] sm:$0xff]   ;;  %v1170_v41 = vld [vmem:[%s1545_s1 + $0x140] sm:$0xff]  }
   0xa   :  { %1035 = vmatprep.subr.bf16.mxu1 %v1141_v9  ;;  %v1157_v25 = vld [vmem:[%s1545_s1 + $0xf0] sm:$0xff]   ;;  %v1161_v30 = vld [vmem:[%s1545_s1 + $0xf8] sm:$0xff]   ;;  %v1171_v42 = vld [vmem:[%s1545_s1 + $0x1c0] sm:$0xff]  }
   0xb   :  { %v1158_v26 = vld [vmem:[%s1545_s1 + $0x30] sm:$0xff]   ;;  %v1162_v31 = vld [vmem:[%s1545_s1 + $0x38] sm:$0xff]   ;;  %v1172_v52 = vld [vmem:[%s1545_s1 + $0x100] sm:$0xff]  }
   0xc   :  { %1014 = vmatpush3.bf16.msra.mxu0 %v1142_v10  ;;  %v1159_v27 = vld [vmem:[%s1545_s1 + $0xb0] sm:$0xff]   ;;  %v1163_v32 = vld [vmem:[%s1545_s1 + $0xb8] sm:$0xff]   ;;  %v1173_v53 = vld [vmem:[%s1545_s1 + $0x180] sm:$0xff]  }
   0xd   :  { %1036 = vmatpush3.bf16.msra.mxu1 %v1143_v11  ;;  %1015 = vmatprep.subr.bf16.mxu0 %v1144_v12  ;;  %v1164_v33 = vld [vmem:[%s1544_s0] ss:$16 sps:$4 sm:$0xff]   ;;  %v1168_v38 = vld [vmem:[%s1544_s0 + $0x4] ss:$16 sps:$4 sm:$0xff]   ;;  %v1174_v58 = vld [vmem:[%s1545_s1 + $0x148] sm:$0xff]  }
   0xe   :  { %1037 = vmatprep.subr.bf16.mxu1 %v1145_v13  ;;  %v1166_v37 = vld [vmem:[%s1544_s0 + $0x20] ss:$16 sps:$4 sm:$0xff]   ;;  %v1169_v39 = vld [vmem:[%s1544_s0 + $0x24] ss:$16 sps:$4 sm:$0xff]   ;;  %v48_v44 = vrot.slane %v1164_v33, %v1390_v43  ;;  %v55_v46 = vrot.slane %v1168_v38, %v1390_v43  ;;  %v1175_v59 = vld [vmem:[%s1545_s1 + $0x1c8] sm:$0xff]  }
   0xf   :  { %v62_v45 = vrot.slane %v1166_v37, %v1390_v43  ;;  %v69_v47 = vrot.slane %v1169_v39, %v1390_v43  ;;  %v1176_v60 = vld [vmem:[%s1545_s1 + $0x108] sm:$0xff]   ;;  %v1178_v62 = vld [vmem:[%s1545_s1 + $0x150] sm:$0xff]   ;;  %v1182_v2 = vld [vmem:[%s1545_s1 + $0x158] sm:$0xff]   ;;  %v1241_v39 = vmov 0.0  }
  0x10   :  { %1016 = vmatpush3.bf16.msra.mxu0 %v1146_v14  ;;  %v1177_v61 = vld [vmem:[%s1545_s1 + $0x188] sm:$0xff]   ;;  %v1179_v63 = vld [vmem:[%s1545_s1 + $0x1d0] sm:$0xff]   ;;  %v1183_v3 = vld [vmem:[%s1545_s1 + $0x1d8] sm:$0xff]  }
  0x11   :  { %1038 = vmatpush3.bf16.msra.mxu1 %v1147_v15  ;;  %1017 = vmatprep.subr.bf16.mxu0 %v1148_v16  ;;  %v71_v48 = vcombine.high %v48_v44, %v62_v45  ;;  %v73_v49 = vcombine.high %v55_v46, %v69_v47  ;;  %v70_v50 = vcombine.low %v48_v44, %v62_v45  ;;  %v1180_v0 = vld [vmem:[%s1545_s1 + $0x110] sm:$0xff]   ;;  %v1184_v4 = vld [vmem:[%s1545_s1 + $0x118] sm:$0xff]   ;;  %v1186_v6 = vld [vmem:[%s1545_s1 + $0x160] sm:$0xff]  }
  0x12   :  { %1039 = vmatprep.subr.bf16.mxu1 %v1149_v17  ;;  %v72_v51 = vcombine.low %v55_v46, %v69_v47  ;;  %v1181_v1 = vld [vmem:[%s1545_s1 + $0x190] sm:$0xff]   ;;  %v1185_v5 = vld [vmem:[%s1545_s1 + $0x198] sm:$0xff]   ;;  %v1187_v7 = vld [vmem:[%s1545_s1 + $0x1e0] sm:$0xff]  }
  0x13   :  { %v119_v54 = vpack.c.bf16 %v71_v48, %v71_v48  ;;  %v121_v55 = vpack.c.bf16 %v73_v49, %v73_v49  ;;  %v118_v56 = vpack.c.bf16 %v70_v50, %v70_v50  ;;  %v1188_v8 = vld [vmem:[%s1545_s1 + $0x120] sm:$0xff]   ;;  %v1190_v10 = vld [vmem:[%s1545_s1 + $0x168] sm:$0xff]   ;;  %v1194_v14 = vld [vmem:[%s1545_s1 + $0x170] sm:$0xff]  }
  0x14   :  { %1018 = vmatpush3.bf16.msra.mxu0 %v1150_v18  ;;  %v120_v57 = vpack.c.bf16 %v72_v51, %v72_v51  ;;  %v1189_v9 = vld [vmem:[%s1545_s1 + $0x1a0] sm:$0xff]   ;;  %v1191_v11 = vld [vmem:[%s1545_s1 + $0x1e8] sm:$0xff]   ;;  %v1195_v15 = vld [vmem:[%s1545_s1 + $0x1f0] sm:$0xff]  }
  0x15   :  { %1040 = vmatpush3.bf16.msra.mxu1 %v1151_v19  ;;  %1019 = vmatprep.subr.bf16.mxu0 %v1152_v20  ;;  %v1192_v12 = vld [vmem:[%s1545_s1 + $0x128] sm:$0xff]   ;;  %v1196_v16 = vld [vmem:[%s1545_s1 + $0x130] sm:$0xff]   ;;  %v1198_v18 = vld [vmem:[%s1545_s1 + $0x178] sm:$0xff]  }
  0x16   :  { %1041 = vmatprep.subr.bf16.mxu1 %v1153_v21  ;;  %677 = vmatprep.mubr.bf16.mxu0 %v119_v54  ;;  %v1193_v13 = vld [vmem:[%s1545_s1 + $0x1a8] sm:$0xff]   ;;  %v1197_v17 = vld [vmem:[%s1545_s1 + $0x1b0] sm:$0xff]   ;;  %v1199_v19 = vld [vmem:[%s1545_s1 + $0x1f8] sm:$0xff]  }
  0x17   :  { %717 = vmatprep.mubr.bf16.mxu1 %v121_v55  ;;  %v1202_v20 = vld [vmem:[%s1544_s0 + $0x8] ss:$16 sps:$4 sm:$0xff]   ;;  %v1208_v38 = vld [vmem:[%s1547_s3] sm:$0xff]   ;;  %v1214_v45 = vld [vmem:[%s1547_s3 + $0x30] sm:$0xff]  }
  0x18   :  { %1020 = vmatpush3.bf16.msra.mxu0 %v1154_v22  ;;  %v1204_v21 = vld [vmem:[%s1544_s0 + $0x28] ss:$16 sps:$4 sm:$0xff]   ;;  %v935_v49 = vld [vmem:[%s1546_s2] ss:$0 sm:$0xff] }
  0x19   :  { %1042 = vmatpush3.bf16.msra.mxu1 %v1155_v23  ;;  %1021 = vmatprep.subr.bf16.mxu0 %v1156_v24  ;;  %v1200_v22 = vld [vmem:[%s1545_s1 + $0x138] sm:$0xff]   ;;  %v1209_v40 = vld [vmem:[%s1547_s3 + $0x8] sm:$0xff]  }
  0x1a   :  { %1043 = vmatprep.subr.bf16.mxu1 %v1157_v25  ;;  %v1201_v23 = vld [vmem:[%s1545_s1 + $0x1b8] sm:$0xff]   ;;  %v1213_v44 = vld [vmem:[%s1547_s3 + $0x28] sm:$0xff]  }
  0x1b   :  { %v1206_v24 = vld [vmem:[%s1544_s0 + $0xc] ss:$16 sps:$4 sm:$0xff]  }
  0x1c   :  { %1022 = vmatpush3.bf16.msra.mxu0 %v1158_v26  ;;  %v1207_v25 = vld [vmem:[%s1544_s0 + $0x2c] ss:$16 sps:$4 sm:$0xff]   ;;  %v84_v26 = vrot.slane %v1202_v20, %v1390_v43 }
  0x1d   :  { %1044 = vmatpush3.bf16.msra.mxu1 %v1159_v27  ;;  %1023 = vmatprep.subr.bf16.mxu0 %v1160_v28  ;;  %v98_v27 = vrot.slane %v1204_v21, %v1390_v43  ;;  %v91_v28 = vrot.slane %v1206_v24, %v1390_v43  ;;  %v105_v29 = vrot.slane %v1207_v25, %v1390_v43  ;;  %v1212_v43 = vld [vmem:[%s1547_s3 + $0x20] sm:$0xff]   ;;  %v1215_v46 = vld [vmem:[%s1547_s3 + $0x38] sm:$0xff]  }
  0x1e   :  { %1045 = vmatprep.subr.bf16.mxu1 %v1161_v30 }
  0x1f   :  { %v107_v30 = vcombine.high %v84_v26, %v98_v27  ;;  %v108_v33 = vcombine.low %v91_v28, %v105_v29 }
  0x20   :  { %1024 = vmatpush3.bf16.msra.mxu0 %v1162_v31  ;;  %v106_v31 = vcombine.low %v84_v26, %v98_v27 }
  0x21   :  { %1046 = vmatpush3.bf16.msra.mxu1 %v1163_v32  ;;  %1053 = vmatprep.subr.bf16.mxu0 %v1170_v41  ;;  %v109_v32 = vcombine.high %v91_v28, %v105_v29  ;;  %v123_v34 = vpack.c.bf16 %v107_v30, %v107_v30  ;;  %v124_v37 = vpack.c.bf16 %v108_v33, %v108_v33  ;;  %v1210_v41 = vld [vmem:[%s1547_s3 + $0x10] sm:$0xff]  }
  0x22   :  { %1075 = vmatprep.subr.bf16.mxu1 %v1171_v42  ;;  %v122_v35 = vpack.c.bf16 %v106_v31, %v106_v31  ;;  %v1211_v42 = vld [vmem:[%s1547_s3 + $0x18] sm:$0xff]  }
  0x23   :  { %678 = vmatmul.mubr.bf16.vlgmr.msra.gmra.mrb[0].mxu0 %v118_v56  ;;  %v125_v36 = vpack.c.bf16 %v109_v32, %v109_v32 }
  0x24   :  { %718 = vmatmul.mubr.bf16.vlgmr.msra.gmra.mrb[0].mxu1 %v120_v57  ;;  %1054 = vmatpush3.bf16.msra.mxu0 %v1172_v52 }
  0x25   :  { %1076 = vmatpush3.bf16.msra.mxu1 %v1173_v53  ;;  %1055 = vmatprep.subr.bf16.mxu0 %v1174_v58 }
  0x26   :  { %1077 = vmatprep.subr.bf16.mxu1 %v1175_v59  ;;  %757 = vmatprep.mubr.bf16.mxu0 %v123_v34 }
  0x27   :  { %797 = vmatprep.mubr.bf16.mxu1 %v125_v36 }
  0x28   :  { %1056 = vmatpush3.bf16.msra.mxu0 %v1176_v60 }
  0x29   :  { %1078 = vmatpush3.bf16.msra.mxu1 %v1177_v61  ;;  %1057 = vmatprep.subr.bf16.mxu0 %v1178_v62 }
  0x2a   :  { %1079 = vmatprep.subr.bf16.mxu1 %v1179_v63 }
  0x2c   :  { %1058 = vmatpush3.bf16.msra.mxu0 %v1180_v0 }
  0x2d   :  { %1080 = vmatpush3.bf16.msra.mxu1 %v1181_v1  ;;  %1059 = vmatprep.subr.bf16.mxu0 %v1182_v2 }
  0x2e   :  { %1081 = vmatprep.subr.bf16.mxu1 %v1183_v3 }
  0x30   :  { %1060 = vmatpush3.bf16.msra.mxu0 %v1184_v4 }
  0x31   :  { %1082 = vmatpush3.bf16.msra.mxu1 %v1185_v5  ;;  %1061 = vmatprep.subr.bf16.mxu0 %v1186_v6 }
  0x32   :  { %1083 = vmatprep.subr.bf16.mxu1 %v1187_v7 }
  0x34   :  { %1062 = vmatpush3.bf16.msra.mxu0 %v1188_v8 }
  0x35   :  { %1084 = vmatpush3.bf16.msra.mxu1 %v1189_v9  ;;  %1063 = vmatprep.subr.bf16.mxu0 %v1190_v10  ;;  %v1000_v10 = vld [vmem:[%s1548_s4] ss:$0 sm:$0xff] }
  0x36   :  { %1085 = vmatprep.subr.bf16.mxu1 %v1191_v11 }
  0x38   :  { %1064 = vmatpush3.bf16.msra.mxu0 %v1192_v12 }
  0x39   :  { %1086 = vmatpush3.bf16.msra.mxu1 %v1193_v13  ;;  %1065 = vmatprep.subr.bf16.mxu0 %v1194_v14 }
  0x3a   :  { %1087 = vmatprep.subr.bf16.mxu1 %v1195_v15 }
  0x3c   :  { %1066 = vmatpush3.bf16.msra.mxu0 %v1196_v16 }
  0x3d   :  { %1088 = vmatpush3.bf16.msra.mxu1 %v1197_v17  ;;  %1067 = vmatprep.subr.bf16.mxu0 %v1198_v18 }
  0x3e   :  { %1089 = vmatprep.subr.bf16.mxu1 %v1199_v19 }
  0x40   :  { %1068 = vmatpush3.bf16.msra.mxu0 %v1200_v22 }
  0x41   :  { %1090 = vmatpush3.bf16.msra.mxu1 %v1201_v23  ;;  %1106 = vmatprep.subr.bf16.mxu0 %v1241_v39 }
  0x43   :  { %758 = vmatmul.mubr.bf16.vlgmr.msra.gmra.mrb[4].mxu0 %v122_v35 }
  0x44   :  { %798 = vmatmul.mubr.bf16.vlgmr.msra.gmra.mrb[4].mxu1 %v124_v37  ;;  %1107 = vmatpush3.bf16.msra.mxu0 %v1208_v38 }
  0x45   :  { %1108 = vmatprep.subr.bf16.mxu0 %v1241_v39  ;;  %1122 = vmatprep.mubr.msk.bf16.mxu0 %vm1242_vm0, %v1241_v39 }
  0x48   :  { %1109 = vmatpush3.bf16.msra.mxu0 %v1209_v40 }
  0x49   :  { %1110 = vmatprep.subr.bf16.mxu0 %v1241_v39 }
  0x4c   :  { %1111 = vmatpush3.bf16.msra.mxu0 %v1210_v41 }
  0x4d   :  { %1112 = vmatprep.subr.bf16.mxu0 %v1241_v39 }
  0x50   :  { %1113 = vmatpush3.bf16.msra.mxu0 %v1211_v42 }
  0x51   :  { %1114 = vmatprep.subr.bf16.mxu0 %v1241_v39 }
  0x54   :  { %1115 = vmatpush3.bf16.msra.mxu0 %v1212_v43 }
  0x55   :  { %1116 = vmatprep.subr.bf16.mxu0 %v1241_v39 }
  0x58   :  { %1117 = vmatpush3.bf16.msra.mxu0 %v1213_v44 }
  0x59   :  { %1118 = vmatprep.subr.bf16.mxu0 %v1241_v39 }
  0x5c   :  { %1119 = vmatpush3.bf16.msra.mxu0 %v1214_v45 }
  0x5d   :  { %1120 = vmatprep.subr.bf16.mxu0 %v1241_v39 }
  0x60   :  { %1121 = vmatpush3.bf16.msra.mxu0 %v1215_v46 }
  0xf6   :  { %v1025_v47 = vpop.f32.mrb[0].mxu0 }
  0xf7   :  { %v1047_v48 = vpop.f32.mrb[0].mxu1  ;;  %v1026_v50 = vpop.f32.mrb[1].mxu0 }
  0xf8   :  { %v1048_v51 = vpop.f32.mrb[1].mxu1  ;;  %v1027_v52 = vadd.f32 %v1026_v50, %v1025_v47  ;;  %v1028_v54 = vpop.f32.mrb[2].mxu0 }
  0xf9   :  { %v1049_v53 = vadd.f32 %v1048_v51, %v1047_v48  ;;  %v1050_v55 = vpop.f32.mrb[2].mxu1  ;;  %v1029_v56 = vpop.f32.mrb[3].mxu0 }
  0xfa   :  { %v1051_v57 = vpop.f32.mrb[3].mxu1  ;;  %v680_v58 = vadd.f32 %v1027_v52, %v935_v49 }
  0xfc   :  { %v720_v59 = vadd.f32 %v1049_v53, %v680_v58 }
 0x116   :  { %v1069_v60 = vpop.f32.mrb[4].mxu0 }
 0x117   :  { %v1091_v61 = vpop.f32.mrb[4].mxu1  ;;  %v1070_v62 = vpop.f32.mrb[5].mxu0 }
 0x118   :  { %v1092_v63 = vpop.f32.mrb[5].mxu1  ;;  %v1071_v0 = vadd.f32 %v1070_v62, %v1069_v60  ;;  %v1072_v2 = vpop.f32.mrb[6].mxu0 }
 0x119   :  { %v1093_v1 = vadd.f32 %v1092_v63, %v1091_v61  ;;  %v1094_v3 = vpop.f32.mrb[6].mxu1  ;;  %v1073_v4 = vpop.f32.mrb[7].mxu0 }
 0x11a   :  { %v1095_v5 = vpop.f32.mrb[7].mxu1  ;;  %v760_v6 = vadd.f32 %v1071_v0, %v720_v59 }
 0x11c   :  { %v800_v7 = vadd.f32 %v1093_v1, %v760_v6 }
 0x11e   :  { %v805_v8 = vmax.f32 %v800_v7, 0.0 }
 0x120   :  { %v806_v9 = vpack.c.bf16 %v805_v8, %v805_v8 }
 0x122   :  { %1123 = vmatmul.mubr.bf16.vlgmr.msra.gmra.mrb[8].mxu0 %v806_v9 }
 0x1f5   :  { %v912_v11 = vpop.f32.mrb[8].mxu0 }
 0x1f6   :  { %v913_v12 = vadd.f32 %v1000_v10, %v912_v11  ;;  %v1124_v13 = vpop.f32.mrb[9].mxu0 }
 0x1f7   :  { %v915_v14 = vpop.f32.mrb[10].mxu0 }
 0x1f8   :  { %918 = vst [vmem:[#allocation2] sm:$0xff] %v913_v12  ;;  %v1125_v15 = vpop.f32.mrb[11].mxu0 }
 0x1f9   :  { %923 = vsyncadd [#allocation3], 96  ;;  %s1243_s28 = smov [#allocation2]  }
 0x1fa   :  { %s924_s29 = sshll.u32 %s1243_s28, 4  ;;  %s925_s29 = int_to_ptr.vmem [resolvable:$true] %s924_s29 }
 0x1fb   :  { %s1216_s30 = scalar_lea.vmem %s925_s29, 32  ;;  %s1220_s6 = scalar_lea.vmem %s925_s29, 128 }
 0x1fc   :  { %p1217_p0 = scmp.ne.s32.totalorder %s925_s29, %s1216_s30  ;;  %p1221_p1 = scmp.lt.s32.totalorder %s925_s29, %s925_s29 }
 0x1fd   :  { %p1222_p2 = scmp.lt.s32.totalorder %s1220_s6, %s1216_s30 }
 0x1ff   :  { %p1223_p3 = por %p1222_p2, %p1221_p1 }
 0x201   :  { %p1224_p4 = pnand %p1223_p3, %p1217_p0 }
 0x203   :  { %1227 = shalt.err (!%p1224_p4)
}
 0x204   :  { %s1228_s8 = scalar_lea.hbm %s1549_s5, 32 }
 0x205   :  { %p1229_p5 = scmp.ne.s32.totalorder %s1549_s5, %s1228_s8  ;;  %p1232_p6 = scmp.lt.u32.totalorder %s1228_s8, %s1549_s5 }
 0x207   :  { %p1234_p7 = pnand %p1232_p6, %p1229_p5 }
 0x209   :  { %1237 = shalt.err (!%p1234_p7)
}
 0x20a   :  { %s1244_s1 = smov 32   ;;  %s1245_s12 = smov 2  }
 0x20b   :  { %930 = dma.vmem_to_hbm [thread:$0]  %s925_s29, 32, %s1549_s5, [#allocation3], %s1244_s1, %s1244_s1, %s1245_s12  }
 0x20c   :  { %1238 = dma.done.wait [#allocation3], 128  }
 0x20d   :  { %1239 = vsyncadd [#allocation3], 4294967168 }
 0x20e   :  { %934 = vsyncpa [#allocation3], 1 }

</bundles_post_ra>
